<compile_context>
chip_gen: v7x
topology: tpu7x:2x2x1
jax: 0.10.0
libtpu: 0.0.40
codegen_flags: <defaults>
</compile_context>

<pallas_src>
import functools

import jax
import jax.numpy as jnp
from jax.experimental import pallas as pl
from jax.experimental.pallas import tpu as pltpu


def _leaky_relu(x, alpha):
    return jnp.where(x > 0, x, alpha * x)


def vgg_block_kernel(x_ref, w1_ref, b1_ref, w2_ref, b2_ref, shift_ref, o_ref, *, alpha):
    # ---- conv1: one lane-dense matmul ------------------------------------
    # x_ref[0]  : (H, 3*(W+2)*C_in)  row-unfolded, zero-padded input
    # w1_ref    : (3*(W+2)*C_in, W*C_mid) banded weights (kx taps + W padding folded in)
    act1 = jnp.dot(x_ref[0], w1_ref[...], preferred_element_type=jnp.float32)
    act1 = _leaky_relu(act1 + b1_ref[...], alpha)          # (H, W*C_mid), 128 lanes

    # ---- conv2: one banded matmul per ky tap ------------------------------
    # w2_ref[a] : (W*C_mid, W*C_out) encodes the 3 kx taps + zero padding along W
    t0 = jnp.dot(act1, w2_ref[0], preferred_element_type=jnp.float32)   # ky = 0
    t1 = jnp.dot(act1, w2_ref[1], preferred_element_type=jnp.float32)   # ky = 1
    t2 = jnp.dot(act1, w2_ref[2], preferred_element_type=jnp.float32)   # ky = 2

    # ky row shift (+ zero padding rows) via tiny precomputed (H, H) shift matmuls:
    #   (shift_dn @ t0)[h] = t0[h-1] (row 0 -> 0),  (shift_up @ t2)[h] = t2[h+1] (row H-1 -> 0)
    out = (t1
           + jnp.dot(shift_ref[0], t0, preferred_element_type=jnp.float32)
           + jnp.dot(shift_ref[1], t2, preferred_element_type=jnp.float32))
    out = _leaky_relu(out + b2_ref[...], alpha)            # (H, W*C_out), 128 lanes
    o_ref[...] = out[None]                                 # lane-dense (1, H, W*C_out) store


def _prepare_params(w1, b1, w2, b2, H, W):
    """Fold kx taps + zero 'same' padding along W into banded, lane-dense weights.

    Done once per parameter set (amortized outside the hot path).
    w1: (3,3,C_in,C_mid) HWIO, w2: (3,3,C_mid,C_out) HWIO.
    """
    C_in, C_mid = w1.shape[2], w1.shape[3]
    C_out = w2.shape[3]

    b = jnp.arange(3)[None, :, None]
    w = jnp.arange(W)[None, None, :]

    # conv1 band: input column index p is in PADDED coords, p == w + kx
    p = jnp.arange(W + 2)[:, None, None]
    s1 = (p == w + b).astype(jnp.float32)                          # (W+2, 3, W)
    w1_band = jnp.einsum('pbw,abcd->apcwd', s1, w1.astype(jnp.float32))
    w1_band = w1_band.reshape(3 * (W + 2) * C_in, W * C_mid)       # (3*(W+2)*C_in, W*C_mid)

    # conv2 band: input column index q is UNPADDED, q == w + kx - 1 (borders -> 0)
    q = jnp.arange(W)[:, None, None]
    s2 = (q == w + b - 1).astype(jnp.float32)                      # (W, 3, W)
    w2_band = jnp.einsum('qbw,abcd->aqcwd', s2, w2.astype(jnp.float32))
    w2_band = w2_band.reshape(3, W * C_mid, W * C_out)             # (3, W*C_mid, W*C_out)

    b1_row = jnp.tile(b1.astype(jnp.float32), W)[None, :]          # (1, W*C_mid)
    b2_row = jnp.tile(b2.astype(jnp.float32), W)[None, :]          # (1, W*C_out)

    # ky row-shift matrices for conv2 (built once; (2, H, H) f32)
    r = jnp.arange(H)[:, None]
    c = jnp.arange(H)[None, :]
    shift_dn = (c == r - 1).astype(jnp.float32)                    # out row h <- row h-1
    shift_up = (c == r + 1).astype(jnp.float32)                    # out row h <- row h+1
    shifts = jnp.stack([shift_dn, shift_up])                       # (2, H, H)

    return w1_band, b1_row, w2_band, b2_row, shifts


def vgg_block(x_nchw, w1, b1, w2, b2, alpha):
    """x_nchw: (N, C_in, H, W).  w*: (3, 3, Cin, Cout) HWIO.  b*: (Cout,)."""
    N, C_in, H, W = x_nchw.shape
    C_mid = w1.shape[-1]
    C_out = w2.shape[-1]

    w1_band, b1_row, w2_band, b2_row, shifts = _prepare_params(w1, b1, w2, b2, H, W)

    # NCHW -> lane-dense (N, H+2, (W+2)*C_in), then unfold the 3 ky row taps so
    # conv1 is a single matmul inside the kernel.
    x = jnp.transpose(x_nchw, (0, 2, 3, 1)).astype(jnp.float32)            # NHWC
    xp = jnp.pad(x, ((0, 0), (1, 1), (1, 1), (0, 0)))                      # "same" pad
    xp = xp.reshape(N, H + 2, (W + 2) * C_in)
    x_unf = jnp.concatenate([xp[:, a:a + H, :] for a in range(3)], axis=-1)  # (N, H, 3*(W+2)*C_in)

    K1 = 3 * (W + 2) * C_in
    kernel = functools.partial(vgg_block_kernel, alpha=alpha)

    out_packed = pl.pallas_call(
        kernel,
        out_shape=jax.ShapeDtypeStruct((N, H, W * C_out), jnp.float32),
        grid_spec=pltpu.PrefetchScalarGridSpec(
            num_scalar_prefetch=0,
            grid=(N,),
            in_specs=[
                pl.BlockSpec((1, H, K1), lambda n: (n, 0, 0)),
                pl.BlockSpec((K1, W * C_mid), lambda n: (0, 0)),
                pl.BlockSpec((1, W * C_mid), lambda n: (0, 0)),
                pl.BlockSpec((3, W * C_mid, W * C_out), lambda n: (0, 0, 0)),
                pl.BlockSpec((1, W * C_out), lambda n: (0, 0)),
                pl.BlockSpec((2, H, H), lambda n: (0, 0, 0)),
            ],
            out_specs=pl.BlockSpec((1, H, W * C_out), lambda n: (n, 0, 0)),
        ),
        compiler_params=pltpu.CompilerParams(dimension_semantics=("parallel",)),
    )(x_unf, w1_band, b1_row, w2_band, b2_row, shifts)

    out = out_packed.reshape(N, H, W, C_out)
    return jnp.transpose(out, (0, 3, 1, 2))                                # back to NCHW


def _reference(x_nchw, w1, b1, w2, b2, alpha):
    def conv(x, w, b):
        y = jax.lax.conv_general_dilated(
            x, w, window_strides=(1, 1), padding="SAME",
            dimension_numbers=("NCHW", "HWIO", "NCHW"))
        y = y + b[None, :, None, None]
        return jnp.where(y > 0, y, alpha * y)
    return conv(conv(x_nchw, w1, b1), w2, b2)


if __name__ == "__main__":
    # Module config: in_num=4, out_num=8, bias=True, activation=leaky_relu, alpha=0.1
    # TODO(synk): dim=1/3 variants of sc.ConvType (Conv1d/Conv3d) not implemented;
    #             this kernel covers the 2-D convolution case implied by 4-D input.
    N, C_in, C_out, H, W = 2, 4, 8, 16, 16
    alpha = 0.1

    key = jax.random.PRNGKey(0)
    kx, kw1, kb1, kw2, kb2 = jax.random.split(key, 5)

    x = jax.random.normal(kx, (N, C_in, H, W), dtype=jnp.float32)
    # Deterministic synthetic parameters (HWIO layout; PyTorch OIHW weights would
    # be transposed to HWIO once before calling).
    w1 = 0.1 * jax.random.normal(kw1, (3, 3, C_in, C_out), dtype=jnp.float32)
    b1 = 0.1 * jax.random.normal(kb1, (C_out,), dtype=jnp.float32)
    w2 = 0.1 * jax.random.normal(kw2, (3, 3, C_out, C_out), dtype=jnp.float32)
    b2 = 0.1 * jax.random.normal(kb2, (C_out,), dtype=jnp.float32)

    out = vgg_block(x, w1, b1, w2, b2, alpha)
    out = jax.block_until_ready(out)

    ref = jax.block_until_ready(_reference(x, w1, b1, w2, b2, alpha))
    assert out.shape == (N, C_out, H, W)
    assert jnp.allclose(out, ref, rtol=1e-2, atol=1e-2)

    print("KERNEL_OK")
</pallas_src>

<mosaic_0001>
module attributes {stable_mosaic.version = 11 : i64} {
  func.func @vgg_block_kernel(%arg0: i32, %arg1: memref<1x16x216xf32, #tpu.memory_space<vmem>>, %arg2: memref<216x128xf32, #tpu.memory_space<vmem>>, %arg3: memref<1x128xf32, #tpu.memory_space<vmem>>, %arg4: memref<3x128x128xf32, #tpu.memory_space<vmem>>, %arg5: memref<1x128xf32, #tpu.memory_space<vmem>>, %arg6: memref<2x16x16xf32, #tpu.memory_space<vmem>>, %arg7: memref<1x16x128xf32, #tpu.memory_space<vmem>>) attributes {dimension_semantics = [#tpu.dimension_semantics<parallel>], iteration_bounds = array<i64: 2>, scalar_prefetch = 0 : i64, scratch_operands = 0 : i64, tpu.core_type = #tpu.core_type<tc>, window_params = [{transform_indices = @transform_0, window_bounds = array<i64: 1, 16, 216>}, {pipeline_mode = #tpu.pipeline_mode<synchronous>, transform_indices = @transform_1, window_bounds = array<i64: 216, 128>}, {pipeline_mode = #tpu.pipeline_mode<synchronous>, transform_indices = @transform_2, window_bounds = array<i64: 1, 128>}, {pipeline_mode = #tpu.pipeline_mode<synchronous>, transform_indices = @transform_3, window_bounds = array<i64: 3, 128, 128>}, {pipeline_mode = #tpu.pipeline_mode<synchronous>, transform_indices = @transform_4, window_bounds = array<i64: 1, 128>}, {pipeline_mode = #tpu.pipeline_mode<synchronous>, transform_indices = @transform_5, window_bounds = array<i64: 2, 16, 16>}, {transform_indices = @transform_6, window_bounds = array<i64: 1, 16, 128>}]} {
    %c0 = arith.constant 0 : index
    %c0_0 = arith.constant 0 : index
    %c0_1 = arith.constant 0 : index
    %0 = vector.load %arg1[%c0, %c0_0, %c0_1] : memref<1x16x216xf32, #tpu.memory_space<vmem>>, vector<1x16x216xf32>
    %1 = vector.shape_cast %0 : vector<1x16x216xf32> to vector<16x216xf32>
    %c0_2 = arith.constant 0 : index
    %c0_3 = arith.constant 0 : index
    %2 = vector.load %arg2[%c0_2, %c0_3] : memref<216x128xf32, #tpu.memory_space<vmem>>, vector<216x128xf32>
    %cst = arith.constant dense<0.000000e+00> : vector<16x128xf32>
    %3 = tpu.matmul %1, %2, %cst {dimension_numbers = #tpu.dot_dimension_numbers<[1], [0], [0], [1], [0, 0, 1, 1], [], []>} : vector<16x216xf32>, vector<216x128xf32>, vector<16x128xf32> -> vector<16x128xf32>
    %c0_4 = arith.constant 0 : index
    %c0_5 = arith.constant 0 : index
    %4 = vector.load %arg3[%c0_4, %c0_5] : memref<1x128xf32, #tpu.memory_space<vmem>>, vector<1x128xf32>
    %5 = vector.broadcast %4 : vector<1x128xf32> to vector<16x128xf32>
    %6 = arith.addf %3, %5 : vector<16x128xf32>
    %cst_6 = arith.constant 0.000000e+00 : f32
    %7 = vector.broadcast %cst_6 : f32 to vector<16x128xf32>
    %8 = arith.cmpf ogt, %6, %7 : vector<16x128xf32>
    %cst_7 = arith.constant 1.000000e-01 : f32
    %9 = vector.broadcast %cst_7 : f32 to vector<16x128xf32>
    %10 = arith.mulf %9, %6 : vector<16x128xf32>
    %11 = arith.select %8, %6, %10 : vector<16x128xi1>, vector<16x128xf32>
    %c0_8 = arith.constant 0 : index
    %c0_9 = arith.constant 0 : index
    %c0_10 = arith.constant 0 : index
    %12 = vector.load %arg4[%c0_8, %c0_9, %c0_10] : memref<3x128x128xf32, #tpu.memory_space<vmem>>, vector<1x128x128xf32>
    %13 = vector.shape_cast %12 : vector<1x128x128xf32> to vector<128x128xf32>
    %cst_11 = arith.constant dense<0.000000e+00> : vector<16x128xf32>
    %14 = tpu.matmul %11, %13, %cst_11 {dimension_numbers = #tpu.dot_dimension_numbers<[1], [0], [0], [1], [0, 0, 1, 1], [], []>} : vector<16x128xf32>, vector<128x128xf32>, vector<16x128xf32> -> vector<16x128xf32>
    %c1 = arith.constant 1 : index
    %c0_12 = arith.constant 0 : index
    %c0_13 = arith.constant 0 : index
    %15 = vector.load %arg4[%c1, %c0_12, %c0_13] : memref<3x128x128xf32, #tpu.memory_space<vmem>>, vector<1x128x128xf32>
    %16 = vector.shape_cast %15 : vector<1x128x128xf32> to vector<128x128xf32>
    %cst_14 = arith.constant dense<0.000000e+00> : vector<16x128xf32>
    %17 = tpu.matmul %11, %16, %cst_14 {dimension_numbers = #tpu.dot_dimension_numbers<[1], [0], [0], [1], [0, 0, 1, 1], [], []>} : vector<16x128xf32>, vector<128x128xf32>, vector<16x128xf32> -> vector<16x128xf32>
    %c2 = arith.constant 2 : index
    %c0_15 = arith.constant 0 : index
    %c0_16 = arith.constant 0 : index
    %18 = vector.load %arg4[%c2, %c0_15, %c0_16] : memref<3x128x128xf32, #tpu.memory_space<vmem>>, vector<1x128x128xf32>
    %19 = vector.shape_cast %18 : vector<1x128x128xf32> to vector<128x128xf32>
    %cst_17 = arith.constant dense<0.000000e+00> : vector<16x128xf32>
    %20 = tpu.matmul %11, %19, %cst_17 {dimension_numbers = #tpu.dot_dimension_numbers<[1], [0], [0], [1], [0, 0, 1, 1], [], []>} : vector<16x128xf32>, vector<128x128xf32>, vector<16x128xf32> -> vector<16x128xf32>
    %c0_18 = arith.constant 0 : index
    %c0_19 = arith.constant 0 : index
    %c0_20 = arith.constant 0 : index
    %21 = vector.load %arg6[%c0_18, %c0_19, %c0_20] : memref<2x16x16xf32, #tpu.memory_space<vmem>>, vector<1x16x16xf32>
    %22 = vector.shape_cast %21 : vector<1x16x16xf32> to vector<16x16xf32>
    %cst_21 = arith.constant dense<0.000000e+00> : vector<16x128xf32>
    %23 = tpu.matmul %22, %14, %cst_21 {dimension_numbers = #tpu.dot_dimension_numbers<[1], [0], [0], [1], [0, 0, 1, 1], [], []>} : vector<16x16xf32>, vector<16x128xf32>, vector<16x128xf32> -> vector<16x128xf32>
    %24 = arith.addf %17, %23 : vector<16x128xf32>
    %c1_22 = arith.constant 1 : index
    %c0_23 = arith.constant 0 : index
    %c0_24 = arith.constant 0 : index
    %25 = vector.load %arg6[%c1_22, %c0_23, %c0_24] : memref<2x16x16xf32, #tpu.memory_space<vmem>>, vector<1x16x16xf32>
    %26 = vector.shape_cast %25 : vector<1x16x16xf32> to vector<16x16xf32>
    %cst_25 = arith.constant dense<0.000000e+00> : vector<16x128xf32>
    %27 = tpu.matmul %26, %20, %cst_25 {dimension_numbers = #tpu.dot_dimension_numbers<[1], [0], [0], [1], [0, 0, 1, 1], [], []>} : vector<16x16xf32>, vector<16x128xf32>, vector<16x128xf32> -> vector<16x128xf32>
    %28 = arith.addf %24, %27 : vector<16x128xf32>
    %c0_26 = arith.constant 0 : index
    %c0_27 = arith.constant 0 : index
    %29 = vector.load %arg5[%c0_26, %c0_27] : memref<1x128xf32, #tpu.memory_space<vmem>>, vector<1x128xf32>
    %30 = vector.broadcast %29 : vector<1x128xf32> to vector<16x128xf32>
    %31 = arith.addf %28, %30 : vector<16x128xf32>
    %cst_28 = arith.constant 0.000000e+00 : f32
    %32 = vector.broadcast %cst_28 : f32 to vector<16x128xf32>
    %33 = arith.cmpf ogt, %31, %32 : vector<16x128xf32>
    %cst_29 = arith.constant 1.000000e-01 : f32
    %34 = vector.broadcast %cst_29 : f32 to vector<16x128xf32>
    %35 = arith.mulf %34, %31 : vector<16x128xf32>
    %36 = arith.select %33, %31, %35 : vector<16x128xi1>, vector<16x128xf32>
    %37 = vector.shape_cast %36 : vector<16x128xf32> to vector<1x16x128xf32>
    %c0_30 = arith.constant 0 : index
    %c0_31 = arith.constant 0 : index
    %c0_32 = arith.constant 0 : index
    %38 = vector.load %arg7[%c0_30, %c0_31, %c0_32] : memref<1x16x128xf32, #tpu.memory_space<vmem>>, vector<1x16x128xf32>
    tpu.vector_store %arg7[%c0_30, %c0_31, %c0_32], %37 {strides = array<i32>} : memref<1x16x128xf32, #tpu.memory_space<vmem>>, vector<1x16x128xf32>,
    return
  }
  func.func @transform_0(%arg0: i32) -> (i32, i32, i32) {
    %c0_i32 = arith.constant 0 : i32
    %c0_i32_0 = arith.constant 0 : i32
    %c0_i32_1 = arith.constant 0 : i32
    return %arg0, %c0_i32, %c0_i32_0 : i32, i32, i32
  }
  func.func @transform_1(%arg0: i32) -> (i32, i32) {
    %c0_i32 = arith.constant 0 : i32
    %c0_i32_0 = arith.constant 0 : i32
    %c0_i32_1 = arith.constant 0 : i32
    return %c0_i32, %c0_i32_0 : i32, i32
  }
  func.func @transform_2(%arg0: i32) -> (i32, i32) {
    %c0_i32 = arith.constant 0 : i32
    %c0_i32_0 = arith.constant 0 : i32
    %c0_i32_1 = arith.constant 0 : i32
    return %c0_i32, %c0_i32_0 : i32, i32
  }
  func.func @transform_3(%arg0: i32) -> (i32, i32, i32) {
    %c0_i32 = arith.constant 0 : i32
    %c0_i32_0 = arith.constant 0 : i32
    %c0_i32_1 = arith.constant 0 : i32
    %c0_i32_2 = arith.constant 0 : i32
    return %c0_i32, %c0_i32_0, %c0_i32_1 : i32, i32, i32
  }
  func.func @transform_4(%arg0: i32) -> (i32, i32) {
    %c0_i32 = arith.constant 0 : i32
    %c0_i32_0 = arith.constant 0 : i32
    %c0_i32_1 = arith.constant 0 : i32
    return %c0_i32, %c0_i32_0 : i32, i32
  }
  func.func @transform_5(%arg0: i32) -> (i32, i32, i32) {
    %c0_i32 = arith.constant 0 : i32
    %c0_i32_0 = arith.constant 0 : i32
    %c0_i32_1 = arith.constant 0 : i32
    %c0_i32_2 = arith.constant 0 : i32
    return %c0_i32, %c0_i32_0, %c0_i32_1 : i32, i32, i32
  }
  func.func @transform_6(%arg0: i32) -> (i32, i32, i32) {
    %c0_i32 = arith.constant 0 : i32
    %c0_i32_0 = arith.constant 0 : i32
    %c0_i32_1 = arith.constant 0 : i32
    return %arg0, %c0_i32, %c0_i32_0 : i32, i32, i32
  }
}

</mosaic_0001>

<bundles_post_ra>
// kernel: tpu_custom_call.1
= control target key start
LH: loop header
LB: loop body
LE: loop exit
PB: predicated region body
PF: predicated region fallthrough
CT: control target
= control target key end

     0   :  { %11 = vsyncpa [#allocation3], 0  ;;  %s1999_s0 = inlined_call_operand.hbm [shape: f32[2,16,216], index: 0, kind: input, shape index: {}]   ;;  %s2000_s1 = inlined_call_operand.hbm [shape: f32[216,128], index: 1, kind: input, shape index: {}]   ;;  %s2001_s2 = inlined_call_operand.vmem [shape: f32[1,128], index: 2, kind: input, shape index: {}]   ;;  %s2002_s3 = inlined_call_operand.hbm [shape: f32[3,128,128], index: 3, kind: input, shape index: {}]   ;;  %s2003_s4 = inlined_call_operand.vmem [shape: f32[1,128], index: 4, kind: input, shape index: {}]   ;;  %s2004_s5 = inlined_call_operand.hbm [shape: f32[2,16,16], index: 5, kind: input, shape index: {}]   ;;  %s2005_s6 = inlined_call_operand.hbm [shape: f32[2,16,128], index: 6, kind: output, shape index: {}]  }
   0x1   :  { %13 = vsyncpa [#allocation3 + $0x1], 0 }
   0x2   :  { %14 = vsyncpa [#allocation6], 0 }
   0x3   :  { %15 = vsyncpa [#allocation9], 0 }
   0x4   :  { %16 = vsyncpa [#allocation4], 0 }
   0x5   :  { %18 = vsyncpa [#allocation4 + $0x1], 0  ;;  %s1699_s21 = smov 0   ;;  %s1701_s22 = smov 0  }
   0x6   :  { %s1703_s23 = smov 0   ;;  %s1705_s24 = smov 0  }
   0x7 LB: > { %s1720_s25 = sadd.s32 4294967295, %s1649_s24   ;;  %s1018_s26 = sadd.s32 4294967294, %s1649_s24   ;;  %s1649_s24 = sphi %s1705_s24, %s2028_s24   ;;  %s1645_s23 = sphi %s1703_s23, %s2027_s23   ;;  %s1641_s22 = sphi %s1701_s22, %s2026_s22   ;;  %s1637_s21 = sphi %s1699_s21, %s2025_s21  }
   0x8   : > { %p44_p0 = scmp.ne.s32.totalorder %s1641_s22, %s1637_s21  ;;  %p2006_p1 = scmp.eq.s32.totalorder %s1720_s25, 0 }
   0x9   : > { %p179_p3 = scmp.eq.s32.totalorder %s1018_s26, 1  ;;  %p1019_p5 = scmp.ge.s32.totalorder %s1649_s24, 1 }
   0xa   : > { %p1729_p4 = por %p2006_p1, %p44_p0  ;;  %p186_p7 = scmp.lt.s32.totalorder %s1649_s24, 3 }
   0xb   : > { %p1734_p6 = por %p179_p3, %p44_p0  ;;  %s1651_s30 = smov [#allocation5]  }
   0xc   : > { %s2009_s27 = scalar_select %p1729_p4, 1, 0 }
   0xd   : > { %s2010_s28 = scalar_select %p1734_p6, 1, 0 }
   0xe   : > { %p1739_p8 = pnand %p1019_p5, %p186_p7  ;;  %s198_s7 = sshll.u32 %s1651_s30, 4  ;;  %s1743_s7 = int_to_ptr.vmem [resolvable:$true] %s198_s7 }
   0xf   : > { %s1652_s9 = smov [#allocation7]   ;;  %s1653_s11 = smov [#allocation8]  }
  0x10   : > { %s2011_s29 = scalar_select %p1739_p8, 1, 0 }
  0x11   : > { %p1392_p9 = pneg %p1739_p8  ;;  %s214_s10 = sshll.u32 %s1652_s9, 4  ;;  %s1754_s10 = int_to_ptr.vmem [resolvable:$true] %s214_s10 }
  0x12   : > { %s1756_s12 = sshll.u32 %s1653_s11, 4  ;;  %s1461_s15 = scalar_lea.hbm %s2000_s1, 3456  ;;  %s231_s12 = int_to_ptr.vmem [resolvable:$true] %s1756_s12 }
  0x13   : > { %p1750_p11 = pnand %p1392_p9, %p2006_p1  ;;  %p1462_p12 = scmp.ne.s32.totalorder %s2000_s1, %s1461_s15 }
  0x14   : > { %p1468_p5 = scmp.lt.u32.totalorder %s1461_s15, %s2000_s1 }
  0x15   : > { %p1766_p13 = pneg %p1750_p11 }
  0x17   : > { %p1464_p0 = pnand %p1766_p13, %p1462_p12 }
  0x19   : > { %p1465_p3 = pneg %p1464_p0 }
  0x1b   : > { %p1470_p7 = pnand %p1468_p5, %p1465_p3 }
  0x1d   : > { %1473 = shalt.err (!%p1470_p7)
}
  0x1e   : > { %s1474_s26 = scalar_lea.vmem %s1743_s7, 3456  ;;  %p1482_p2 = scmp.lt.s32.totalorder %s1743_s7, %s1743_s7 }
  0x1f   : > { %p1475_p9 = scmp.ne.s32.totalorder %s1743_s7, %s1474_s26  ;;  %p1483_p6 = scmp.lt.s32.totalorder %s1474_s26, %s1474_s26 }
  0x21   : > { %p1477_p10 = pnand %p1475_p9, %p1766_p13  ;;  %p1484_p12 = por %p1483_p6, %p1482_p2 }
  0x23   : > { %p1478_p1 = pneg %p1477_p10 }
  0x25   : > { %p1485_p0 = pnand %p1484_p12, %p1478_p1 }
  0x27   : > { %1488 = shalt.err (!%p1485_p0)
}
  0x28   : > { %s1654_s30 = smov 128   ;;  %s1655_s9 = smov 8  }
  0x29   : > { %1395 = dma.hbm_to_vmem [thread:$0]  (!%p1750_p11), %s2000_s1, 3456, %s1743_s7, [#allocation6], %s1654_s30, %s1654_s30, %s1655_s9  }
  0x2a   : > { %s1489_s16 = scalar_lea.hbm %s2002_s3, 6144 }
  0x2b   : > { %p1490_p1 = scmp.ne.s32.totalorder %s2002_s3, %s1489_s16  ;;  %p1496_p10 = scmp.lt.u32.totalorder %s1489_s16, %s2002_s3 }
  0x2d   : > { %p1492_p2 = pnand %p1490_p1, %p1766_p13 }
  0x2f   : > { %p1493_p6 = pneg %p1492_p2 }
  0x31   : > { %p1498_p3 = pnand %p1496_p10, %p1493_p6 }
  0x33   : > { %1501 = shalt.err (!%p1498_p3)
}
  0x34   : > { %s1502_s7 = scalar_lea.vmem %s1754_s10, 6144  ;;  %p1510_p12 = scmp.lt.s32.totalorder %s1754_s10, %s1754_s10 }
  0x35   : > { %p1503_p5 = scmp.ne.s32.totalorder %s1754_s10, %s1502_s7  ;;  %p1511_p0 = scmp.lt.s32.totalorder %s1502_s7, %s1502_s7 }
  0x37   : > { %p1505_p7 = pnand %p1503_p5, %p1766_p13  ;;  %p1512_p1 = por %p1511_p0, %p1510_p12 }
  0x39   : > { %p1506_p9 = pneg %p1505_p7 }
  0x3b   : > { %p1513_p2 = pnand %p1512_p1, %p1506_p9 }
  0x3d   : > { %1516 = shalt.err (!%p1513_p2)
}
  0x3e   : > { %1398 = dma.hbm_to_vmem [thread:$0]  (!%p1750_p11), %s2002_s3, 6144, %s1754_s10, [#allocation6], %s1654_s30, %s1654_s30, %s1655_s9  }
  0x3f   : > { %s1517_s16 = scalar_lea.hbm %s2004_s5, 512 }
  0x40   : > { %p1518_p6 = scmp.ne.s32.totalorder %s2004_s5, %s1517_s16  ;;  %p1524_p5 = scmp.lt.u32.totalorder %s1517_s16, %s2004_s5 }
  0x42   : > { %p1520_p10 = pnand %p1518_p6, %p1766_p13 }
  0x44   : > { %p1521_p3 = pneg %p1520_p10 }
  0x46   : > { %p1526_p7 = pnand %p1524_p5, %p1521_p3 }
  0x48   : > { %1529 = shalt.err (!%p1526_p7)
}
  0x49   : > { %s1530_s7 = scalar_lea.vmem %s231_s12, 512  ;;  %p1538_p1 = scmp.lt.s32.totalorder %s231_s12, %s231_s12 }
  0x4a   : > { %p1531_p9 = scmp.ne.s32.totalorder %s231_s12, %s1530_s7  ;;  %p1539_p2 = scmp.lt.s32.totalorder %s1530_s7, %s1530_s7 }
  0x4c   : > { %p1533_p12 = pnand %p1531_p9, %p1766_p13  ;;  %p1540_p4 = por %p1539_p2, %p1538_p1 }
  0x4e   : > { %p1534_p0 = pneg %p1533_p12 }
  0x50   : > { %p1541_p8 = pnand %p1540_p4, %p1534_p0 }
  0x52   : > { %1544 = shalt.err (!%p1541_p8)
}
  0x53   : > { %1401 = dma.hbm_to_vmem [thread:$0]  (!%p1750_p11), %s2004_s5, 512, %s231_s12, [#allocation9], %s1654_s30, %s1654_s30, %s1655_s9  }
  0x54   : > { %s1839_s18 = sadd.s32 1, %s1649_s24   ;;  %s31_s13 = sadd.s32 1, %s1645_s23 }
  0x55   : > { %s28_s8 = ssub.s32 %s1649_s24, %s1839_s18  ;;  %p38_p8 = scmp.ne.s32.totalorder %s1645_s23, %s1641_s22 }
  0x56   : > { %p29_p4 = scmp.eq.s32.totalorder %s28_s8, 0  ;;  %p39_p13 = scmp.eq.s32.totalorder %s1649_s24, 0 }
  0x57   : > { %p1413_p6 = scmp.lt.s32.totalorder %s1649_s24, 2  ;;  %p2014_p3 = scmp.eq.s32.totalorder %s1720_s25, 1 }
  0x58   : > { %s1849_s14 = scalar_select %p29_p4, %s1645_s23, %s31_s13  }
  0x59   : > { %p40_p10 = por %p39_p13, %p38_p8  ;;  %p1853_p5 = por %p2014_p3, %p38_p8 }
  0x5a   : > { %s244_s16 = sand.u32 1, %s1645_s23   ;;  %s1046_s17 = sshll.u32 %s1649_s24, 9 }
  0x5b   : > { %s1024_s12 = sshll.u32 %s244_s16, 5  ;;  %s1862_s19 = scalar_lea.hbm %s1999_s0, %s1046_s17 }
  0x5c   : > { %s248_s20 = scalar_lea.vmem [#allocation2], %s1024_s12  ;;  %p1864_p11 = pnand %p1413_p6, %p40_p10 }
  0x5d   : > { %s255_s26 = sshll.u32 %s248_s20, 4  ;;  %s1870_s10 = scalar_lea.sflag [#allocation3], %s244_s16  ;;  %s1868_s26 = int_to_ptr.vmem [resolvable:$true] %s255_s26 }
  0x5e   : > { %s1545_s11 = scalar_lea.hbm %s1862_s19, 512  ;;  %p1547_p9 = pneg %p1864_p11 }
  0x5f   : > { %p1546_p7 = scmp.ne.s32.totalorder %s1862_s19, %s1545_s11  ;;  %s1550_s17 = scalar_lea.hbm %s1999_s0, 1024 }
  0x60   : > { %p1551_p1 = scmp.lt.u32.totalorder %s1862_s19, %s1999_s0  ;;  %p1552_p2 = scmp.lt.u32.totalorder %s1550_s17, %s1545_s11 }
  0x61   : > { %p1548_p12 = pnand %p1547_p9, %p1546_p7  ;;  %p1554_p8 = scmp.lt.u32.totalorder %s1545_s11, %s1862_s19 }
  0x62   : > { %p1553_p4 = por %p1552_p2, %p1551_p1 }
  0x63   : > { %p1549_p0 = pneg %p1548_p12 }
  0x64   : > { %p1555_p13 = por %p1554_p8, %p1553_p4 }
  0x66   : > { %p1556_p6 = pnand %p1555_p13, %p1549_p0 }
  0x68   : > { %1559 = shalt.err (!%p1556_p6)
}
  0x69   : > { %s1560_s16 = scalar_lea.vmem %s1868_s26, 512  ;;  %s1656_s9 = smov [#allocation2]  }
  0x6a   : > { %p1561_p10 = scmp.ne.s32.totalorder %s1868_s26, %s1560_s16  ;;  %s1565_s20 = sshll.u32 %s1656_s9, 4  ;;  %s1566_s20 = int_to_ptr.vmem [resolvable:$false] %s1565_s20 }
  0x6b   : > { %s1567_s8 = scalar_lea.vmem %s1566_s20, 1024  ;;  %p1568_p12 = scmp.lt.s32.totalorder %s1868_s26, %s1566_s20 }
  0x6c   : > { %p1563_p3 = pnand %p1561_p10, %p1547_p9  ;;  %p1569_p1 = scmp.lt.s32.totalorder %s1567_s8, %s1560_s16 }
  0x6e   : > { %p1564_p7 = pneg %p1563_p3  ;;  %p1570_p2 = por %p1569_p1, %p1568_p12 }
  0x70   : > { %p1571_p4 = pnand %p1570_p2, %p1564_p7 }
  0x72   : > { %1574 = shalt.err (!%p1571_p4)
}
  0x73   : > { %s1657_s11 = smov 256   ;;  %s1658_s13 = smov 16  }
  0x74   : > { %1405 = dma.hbm_to_vmem [thread:$0]  (!%p1864_p11), %s1862_s19, 512, %s1868_s26, %s1870_s10, %s1657_s11, %s1657_s11, %s1658_s13  }
  0x75   : > { %p2017_p9 = scmp.ne.s32.totalorder %s2011_s29, 0 }
  0x76   : > { %s1901_s17 = sand.u32 (!%p2017_p9), 1, %s1641_s22   ;;  %p2018_p0 = scmp.ne.s32.totalorder (!%p2017_p9), %s2009_s27, 0 }
  0x77   : > { %267 = sbr.rel (%p2017_p9) target bundleno = 897 (0x381), region = 44  ;;  %s1028_s12 = sshll.u32 (!%p2017_p9), %s1901_s17, 5 }
  0x78   : > { %s270_s30 = scalar_lea.sflag (!%p2017_p9), [#allocation3], %s1901_s17  ;;  %s1905_s16 = scalar_lea.vmem (!%p2017_p9), [#allocation2], %s1028_s12 }
  0x7e   : > { %1620 = dma.done.wait (%p2018_p0), %s270_s30, 512  }
  0x7f   : > { %1622 = vsyncadd (%p2018_p0), %s270_s30, 4294966784  ;;  %p2019_p11 = scmp.eq.s32.totalorder %s1720_s25, 0 }
  0x81   : > { %1624 = dma.done.wait (%p2019_p11), [#allocation6], 9600   ;;  %p2020_p8 = pmov %p2019_p11 }
  0x83   : > { %1626 = vsyncadd (%p2020_p8), [#allocation6], 4294957696  ;;  %p2021_p13 = pmov %p2020_p8 }
  0x84   : > { %p2022_p6 = pmov %p2020_p8 }
  0x85   : > { %1628 = dma.done.wait (%p2021_p13), [#allocation9], 512  }
  0x86   : > { %1630 = vsyncadd (%p2022_p6), [#allocation9], 4294966784  ;;  %v1659_v0 = vmov 0.0|0.0   ;;  %v318_v1 = vld [vmem:[#allocation5] sm:$0xff]  ;;  %v319_v2 = vld [vmem:[#allocation5 + $0x8] sm:$0xff]  ;;  %vm352_vm0 = vcmask 719872  }
  0x87   : > { %1229 = vmatprep.subr.bf16.mxu0 %v1659_v0  ;;  %v320_v3 = vld [vmem:[#allocation5 + $0x10] sm:$0xff]  ;;  %v1230_v4 = vpack.c.bf16 %v319_v2, %v318_v1  ;;  %v321_v5 = vld [vmem:[#allocation5 + $0x18] sm:$0xff]  ;;  %v322_v7 = vld [vmem:[#allocation5 + $0x20] sm:$0xff]  ;;  %v1660_v63 = vmov 0.0   ;;  %vm642_vm3 = vcmask 130048   ;;  %s1032_s19 = sshll.u32 %s1901_s17, 4 }
  0x88   : > { %v1233_v6 = vpack.c.bf16 %v321_v5, %v320_v3  ;;  %v323_v8 = vld [vmem:[#allocation5 + $0x28] sm:$0xff]  ;;  %v324_v10 = vld [vmem:[#allocation5 + $0x30] sm:$0xff]  ;;  %v325_v11 = vld [vmem:[#allocation5 + $0x38] sm:$0xff]  ;;  %s313_s10 = scalar_lea.vmem [#allocation10], %s1032_s19  ;;  %s1047_s20 = sshll.u32 %s1720_s25, 8 }
  0x89   : > { %1231 = vmatpush1.bf16.msra.mxu0 %v1230_v4  ;;  %v1236_v9 = vpack.c.bf16 %v323_v8, %v322_v7  ;;  %v315_v12 = vld [vmem:[%s1905_s16 + $0x8] sm:$0xff]  ;;  %v440_v13 = vld [vmem:[#allocation7] sm:$0xff]  ;;  %v441_v14 = vld [vmem:[#allocation7 + $0x8] sm:$0xff]  ;;  %v1239_v15 = vpack.c.bf16 %v325_v11, %v324_v10  ;;  %s916_s9 = sshll.u32 %s313_s10, 4  ;;  %s1955_s13 = scalar_lea.hbm %s2005_s6, %s1047_s20  ;;  %s1950_s9 = int_to_ptr.vmem [resolvable:$true] %s916_s9 }
  0x8a   : > { %1232 = vmatprep.subr.bf16.mxu0 %v1659_v0  ;;  %1034 = vmatprep.mubr.msk.f32.mxu0 %vm352_vm0, %v315_v12  ;;  %v1268_v16 = vpack.c.bf16 %v441_v14, %v440_v13  ;;  %v442_v17 = vld [vmem:[#allocation7 + $0x10] sm:$0xff]  ;;  %v326_v18 = vld [vmem:[#allocation5 + $0x40] sm:$0xff]  ;;  %v443_v20 = vld [vmem:[#allocation7 + $0x18] sm:$0xff]  ;;  %s903_s25 = scalar_lea.sflag [#allocation4], %s1901_s17  ;;  %s1575_s12 = scalar_lea.vmem %s1950_s9, 256 }
  0x8b   : > { %v327_v19 = vld [vmem:[#allocation5 + $0x48] sm:$0xff]  ;;  %v1272_v21 = vpack.c.bf16 %v443_v20, %v442_v17  ;;  %v444_v22 = vld [vmem:[#allocation7 + $0x20] sm:$0xff]  ;;  %v445_v23 = vld [vmem:[#allocation7 + $0x28] sm:$0xff]  ;;  %p1576_p10 = scmp.ne.s32.totalorder %s1950_s9, %s1575_s12  ;;  %s1661_s30 = smov [#allocation10]  }
  0x8c   : > { %1269 = vmatprep.subr.bf16.mxu1 %v1268_v16  ;;  %v1242_v24 = vpack.c.bf16 %v327_v19, %v326_v18  ;;  %v328_v25 = vld [vmem:[#allocation5 + $0x50] sm:$0xff]  ;;  %v1276_v26 = vpack.c.bf16 %v445_v23, %v444_v22  ;;  %v329_v27 = vld [vmem:[#allocation5 + $0x58] sm:$0xff]  ;;  %v446_v28 = vld [vmem:[#allocation7 + $0x30] sm:$0xff] }
  0x8d   : > { %1234 = vmatpush1.bf16.msra.mxu0 %v1233_v6  ;;  %1271 = vmatpush3.bf16.msra.mxu1 %v1268_v16  ;;  %v447_v29 = vld [vmem:[#allocation7 + $0x38] sm:$0xff]  ;;  %v1245_v30 = vpack.c.bf16 %v329_v27, %v328_v25  ;;  %v330_v31 = vld [vmem:[#allocation5 + $0x60] sm:$0xff]  ;;  %v331_v33 = vld [vmem:[#allocation5 + $0x68] sm:$0xff]  ;;  %p1577_p3 = pnand %p1576_p10, %p1853_p5 }
  0x8e   : > { %1235 = vmatprep.subr.bf16.mxu0 %v1659_v0  ;;  %1273 = vmatprep.subr.bf16.mxu1 %v1272_v21  ;;  %v1280_v32 = vpack.c.bf16 %v447_v29, %v446_v28  ;;  %v448_v34 = vld [vmem:[#allocation7 + $0x40] sm:$0xff]  ;;  %v449_v35 = vld [vmem:[#allocation7 + $0x48] sm:$0xff]  ;;  %v1248_v36 = vpack.c.bf16 %v331_v33, %v330_v31  ;;  %v332_v37 = vld [vmem:[#allocation5 + $0x70] sm:$0xff] }
  0x8f   : > { %v1284_v38 = vpack.c.bf16 %v449_v35, %v448_v34  ;;  %v333_v39 = vld [vmem:[#allocation5 + $0x78] sm:$0xff]  ;;  %v450_v40 = vld [vmem:[#allocation7 + $0x50] sm:$0xff]  ;;  %v451_v41 = vld [vmem:[#allocation7 + $0x58] sm:$0xff]  ;;  %p1578_p7 = pneg %p1577_p3 }
  0x90   : > { %v1251_v42 = vpack.c.bf16 %v333_v39, %v332_v37  ;;  %v1288_v43 = vpack.c.bf16 %v451_v41, %v450_v40  ;;  %v334_v44 = vld [vmem:[#allocation5 + $0x80] sm:$0xff]  ;;  %v335_v45 = vld [vmem:[#allocation5 + $0x88] sm:$0xff]  ;;  %v336_v47 = vld [vmem:[#allocation5 + $0x90] sm:$0xff] }
  0x91   : > { %1237 = vmatpush1.bf16.msra.mxu0 %v1236_v9  ;;  %1275 = vmatpush3.bf16.msra.mxu1 %v1272_v21  ;;  %v1254_v46 = vpack.c.bf16 %v335_v45, %v334_v44  ;;  %v337_v48 = vld [vmem:[#allocation5 + $0x98] sm:$0xff]  ;;  %v338_v50 = vld [vmem:[#allocation5 + $0xa0] sm:$0xff]  ;;  %v339_v51 = vld [vmem:[#allocation5 + $0xa8] sm:$0xff] }
  0x92   : > { %1238 = vmatprep.subr.bf16.mxu0 %v1659_v0  ;;  %1277 = vmatprep.subr.bf16.mxu1 %v1276_v26  ;;  %v1257_v49 = vpack.c.bf16 %v337_v48, %v336_v47  ;;  %v1260_v52 = vpack.c.bf16 %v339_v51, %v338_v50  ;;  %v340_v53 = vld [vmem:[#allocation5 + $0xb0] sm:$0xff]  ;;  %v341_v54 = vld [vmem:[#allocation5 + $0xb8] sm:$0xff]  ;;  %v342_v56 = vld [vmem:[#allocation5 + $0xc0] sm:$0xff] }
  0x93   : > { %v1263_v55 = vpack.c.bf16 %v341_v54, %v340_v53  ;;  %v343_v57 = vld [vmem:[#allocation5 + $0xc8] sm:$0xff]  ;;  %v532_v59 = vld [vmem:[#allocation7 + $0x80] sm:$0xff]  ;;  %v533_v60 = vld [vmem:[#allocation7 + $0x88] sm:$0xff] }
  0x94   : > { %v1266_v58 = vpack.c.bf16 %v343_v57, %v342_v56  ;;  %v534_v61 = vld [vmem:[#allocation7 + $0x90] sm:$0xff]  ;;  %v535_v62 = vld [vmem:[#allocation7 + $0x98] sm:$0xff]  ;;  %v1336_v2 = vpack.c.bf16 %v533_v60, %v532_v59  ;;  %v314_v3 = vld [vmem:[%s1905_s16] sm:$0xff] }
  0x95   : > { %1240 = vmatpush1.bf16.msra.mxu0 %v1239_v15  ;;  %1279 = vmatpush3.bf16.msra.mxu1 %v1276_v26  ;;  %v344_v1 = vld [vmem:[#allocation5 + $0xd0] sm:$0xff]  ;;  %v317_v4 = vld [vmem:[%s1905_s16 + $0x18] sm:$0xff]  ;;  %v1340_v5 = vpack.c.bf16 %v535_v62, %v534_v61  ;;  %v537_v7 = vld [vmem:[#allocation7 + $0xa8] sm:$0xff] }
  0x96   : > { %1241 = vmatprep.subr.bf16.mxu0 %v1659_v0  ;;  %1281 = vmatprep.subr.bf16.mxu1 %v1280_v32  ;;  %v536_v6 = vld [vmem:[#allocation7 + $0xa0] sm:$0xff]  ;;  %v538_v9 = vld [vmem:[#allocation7 + $0xb0] sm:$0xff]  ;;  %v539_v10 = vld [vmem:[#allocation7 + $0xb8] sm:$0xff] }
  0x97   : > { %v1344_v8 = vpack.c.bf16 %v537_v7, %v536_v6  ;;  %v1348_v11 = vpack.c.bf16 %v539_v10, %v538_v9  ;;  %v540_v12 = vld [vmem:[#allocation7 + $0xc0] sm:$0xff]  ;;  %v541_v13 = vld [vmem:[#allocation7 + $0xc8] sm:$0xff]  ;;  %v542_v15 = vld [vmem:[#allocation7 + $0xd0] sm:$0xff] }
  0x98   : > { %v1352_v14 = vpack.c.bf16 %v541_v13, %v540_v12  ;;  %v543_v16 = vld [vmem:[#allocation7 + $0xd8] sm:$0xff]  ;;  %v452_v18 = vld [vmem:[#allocation7 + $0x60] sm:$0xff]  ;;  %v453_v19 = vld [vmem:[#allocation7 + $0x68] sm:$0xff] }
  0x99   : > { %1243 = vmatpush1.bf16.msra.mxu0 %v1242_v24  ;;  %1283 = vmatpush3.bf16.msra.mxu1 %v1280_v32  ;;  %v1356_v17 = vpack.c.bf16 %v543_v16, %v542_v15  ;;  %v1292_v20 = vpack.c.bf16 %v453_v19, %v452_v18  ;;  %v544_v21 = vld [vmem:[#allocation7 + $0xe0] sm:$0xff]  ;;  %v545_v22 = vld [vmem:[#allocation7 + $0xe8] sm:$0xff]  ;;  %v454_v24 = vld [vmem:[#allocation7 + $0x70] sm:$0xff] }
  0x9a   : > { %1244 = vmatprep.subr.bf16.mxu0 %v1659_v0  ;;  %1285 = vmatprep.subr.bf16.mxu1 %v1284_v38  ;;  %v1360_v23 = vpack.c.bf16 %v545_v22, %v544_v21  ;;  %v455_v25 = vld [vmem:[#allocation7 + $0x78] sm:$0xff]  ;;  %v546_v27 = vld [vmem:[#allocation7 + $0xf0] sm:$0xff]  ;;  %v550_v31 = vld [vmem:[#allocation7 + $0x108] sm:$0xff] }
  0x9b   : > { %v1296_v26 = vpack.c.bf16 %v455_v25, %v454_v24  ;;  %v547_v28 = vld [vmem:[#allocation7 + $0xf8] sm:$0xff]  ;;  %v1033_v33 = vld [vmem:[%s2001_s2] ss:$0 sm:$0xff]  ;;  %v553_v47 = vld [vmem:[#allocation7 + $0x120] sm:$0xff] }
  0x9c   : > { %v1364_v29 = vpack.c.bf16 %v547_v28, %v546_v27  ;;  %v554_v48 = vld [vmem:[#allocation7 + $0x128] sm:$0xff]  ;;  %v555_v50 = vld [vmem:[#allocation7 + $0x130] sm:$0xff]  ;;  %v556_v51 = vld [vmem:[#allocation7 + $0x138] sm:$0xff] }
  0x9d   : > { %1246 = vmatpush1.bf16.msra.mxu0 %v1245_v30  ;;  %1287 = vmatpush3.bf16.msra.mxu1 %v1284_v38  ;;  %v549_v30 = vld [vmem:[#allocation7 + $0x100] sm:$0xff]  ;;  %v558_v54 = vld [vmem:[#allocation7 + $0x148] sm:$0xff]  ;;  %v559_v56 = vld [vmem:[#allocation7 + $0x150] sm:$0xff] }
  0x9e   : > { %1247 = vmatprep.subr.bf16.mxu0 %v1659_v0  ;;  %1289 = vmatprep.subr.bf16.mxu1 %v1288_v43  ;;  %v1300_v32 = vpack.c.bf16 %v550_v31, %v549_v30  ;;  %v557_v53 = vld [vmem:[#allocation7 + $0x140] sm:$0xff]  ;;  %v560_v57 = vld [vmem:[#allocation7 + $0x158] sm:$0xff]  ;;  %v562_v60 = vld [vmem:[#allocation7 + $0x168] sm:$0xff] }
  0x9f   : > { %v561_v59 = vld [vmem:[#allocation7 + $0x160] sm:$0xff]  ;;  %v563_v62 = vld [vmem:[#allocation7 + $0x170] sm:$0xff]  ;;  %v801_v12 = vld [vmem:[#allocation8 + $0x18] sm:$0xff] }
  0xa0   : > { %v1324_v61 = vpack.c.bf16 %v562_v60, %v561_v59  ;;  %v1040_v18 = vld [vmem:[%s2003_s4] ss:$0 sm:$0xff] }
  0xa1   : > { %1249 = vmatpush1.bf16.msra.mxu0 %v1248_v36  ;;  %1291 = vmatpush3.bf16.msra.mxu1 %v1288_v43  ;;  %v552_v43 = vld [vmem:[#allocation7 + $0x118] sm:$0xff] }
  0xa2   : > { %1250 = vmatprep.subr.bf16.mxu0 %v1659_v0  ;;  %1293 = vmatprep.subr.bf16.mxu1 %v1292_v20 }
  0xa5   : > { %1252 = vmatpush1.bf16.msra.mxu0 %v1251_v42  ;;  %1295 = vmatpush3.bf16.msra.mxu1 %v1292_v20  ;;  %v551_v42 = vld [vmem:[#allocation7 + $0x110] sm:$0xff] }
  0xa6   : > { %1253 = vmatprep.subr.bf16.mxu0 %v1659_v0  ;;  %1297 = vmatprep.subr.bf16.mxu1 %v1296_v26  ;;  %v1304_v45 = vpack.c.bf16 %v552_v43, %v551_v42 }
  0xa9   : > { %1255 = vmatpush1.bf16.msra.mxu0 %v1254_v46  ;;  %1299 = vmatpush3.bf16.msra.mxu1 %v1296_v26 }
  0xaa   : > { %1256 = vmatprep.subr.bf16.mxu0 %v1659_v0  ;;  %1301 = vmatprep.subr.bf16.mxu1 %v1300_v32 }
  0xad   : > { %1258 = vmatpush1.bf16.msra.mxu0 %v1257_v49  ;;  %v1308_v49 = vpack.c.bf16 %v554_v48, %v553_v47 }
  0xae   : > { %1259 = vmatprep.subr.bf16.mxu0 %v1659_v0 }
  0xb1   : > { %1261 = vmatpush1.bf16.msra.mxu0 %v1260_v52  ;;  %v1312_v52 = vpack.c.bf16 %v556_v51, %v555_v50 }
  0xb2   : > { %1262 = vmatprep.subr.bf16.mxu0 %v1659_v0 }
  0xb5   : > { %1264 = vmatpush1.bf16.msra.mxu0 %v1263_v55  ;;  %v1316_v55 = vpack.c.bf16 %v558_v54, %v557_v53 }
  0xb6   : > { %1265 = vmatprep.subr.bf16.mxu0 %v1659_v0  ;;  %v316_v0 = vld [vmem:[%s1905_s16 + $0x10] sm:$0xff]  ;;  %s1579_s16 = sshll.u32 %s1661_s30, 4  ;;  %s1580_s16 = int_to_ptr.vmem [resolvable:$false] %s1579_s16 }
  0xb7   : > { %s1581_s27 = scalar_lea.vmem %s1580_s16, 512  ;;  %p1582_p12 = scmp.lt.s32.totalorder %s1950_s9, %s1580_s16 }
  0xb8   : > { %p1583_p1 = scmp.lt.s32.totalorder %s1581_s27, %s1575_s12 }
  0xb9   : > { %1267 = vmatpush1.bf16.msra.mxu0 %v1266_v58  ;;  %v1320_v58 = vpack.c.bf16 %v560_v57, %v559_v56 }
  0xba   : > { %411 = vmatprep.subr.mxu0 %v1660_v63  ;;  %v564_v63 = vld [vmem:[#allocation7 + $0x178] sm:$0xff]  ;;  %p1584_p2 = por %p1583_p1, %p1582_p12 }
  0xbc   : > { %p1585_p4 = pnand %p1584_p2, %p1578_p7 }
  0xbd   : > { %412 = vmatpush1.msra.mxu0 %v344_v1  ;;  %v1328_v1 = vpack.c.bf16 %v564_v63, %v563_v62 }
  0xbe   : > { %424 = vmatmul.mubr.f32.vlgmr.msra.gmra.mrb[0].mxu0 %v314_v3  ;;  %1337 = vmatprep.subr.bf16.mxu0 %v1336_v2 }
  0xbf   : > { %1035 = vmatprep.mubr.msk.f32.mxu0 %vm352_vm0, %v317_v4  ;;  %1339 = vmatpush3.bf16.msra.mxu0 %v1336_v2  ;;  %v640_v2 = vld [vmem:[#allocation8] sm:$0xff] }
  0xc0   : > { %1341 = vmatprep.subr.bf16.mxu0 %v1340_v5 }
  0xc2   : > { %429 = vmatmul.mubr.f32.gmra.mrb[2].mxu0 %v316_v0  ;;  %v641_v0 = vld [vmem:[#allocation8 + $0x8] sm:$0xff] }
  0xc3   : > { %1343 = vmatpush3.bf16.msra.mxu0 %v1340_v5 }
  0xc4   : > { %1345 = vmatprep.subr.bf16.mxu0 %v1344_v8 }
  0xc7   : > { %1347 = vmatpush3.bf16.msra.mxu0 %v1344_v8  ;;  %v800_v8 = vld [vmem:[#allocation8 + $0x10] sm:$0xff] }
  0xc8   : > { %1349 = vmatprep.subr.bf16.mxu0 %v1348_v11 }
  0xcb   : > { %1351 = vmatpush3.bf16.msra.mxu0 %v1348_v11 }
  0xcc   : > { %1353 = vmatprep.subr.bf16.mxu0 %v1352_v14 }
  0xcf   : > { %1355 = vmatpush3.bf16.msra.mxu0 %v1352_v14 }
  0xd0   : > { %1357 = vmatprep.subr.bf16.mxu0 %v1356_v17 }
  0xd3   : > { %1359 = vmatpush3.bf16.msra.mxu0 %v1356_v17 }
  0xd4   : > { %1361 = vmatprep.subr.bf16.mxu0 %v1360_v23 }
  0xd7   : > { %1363 = vmatpush3.bf16.msra.mxu0 %v1360_v23 }
  0xd8   : > { %1365 = vmatprep.subr.bf16.mxu0 %v1364_v29 }
  0xdb   : > { %1367 = vmatpush3.bf16.msra.mxu0 %v1364_v29 }
 0x191   : > { %v425_v34 = vpop.f32.mrb[0].mxu0 }
 0x192   : > { %v426_v35 = vadd.f32 %v1033_v33, %v425_v34  ;;  %v427_v36 = vpop.f32.mrb[1].mxu0 }
 0x194   : > { %v436_v37 = vmul.f32 0.1, %v426_v35  ;;  %vm434_vm1 = vcmp.gt.f32.partialorder %v426_v35, 0.0 }
 0x195   : > { %v430_v38 = vpop.f32.mrb[2].mxu0 }
 0x196   : > { %v431_v39 = vadd.f32 %v1033_v33, %v430_v38  ;;  %v432_v40 = vpop.f32.mrb[3].mxu0  ;;  %v438_v41 = vsel %vm434_vm1, %v426_v35, %v436_v37 }
 0x197   : > { %1142 = vmatprep.mubr.f32.mxu1 %v438_v41  ;;  %1219 = vmatprep.mubr.f32.mxu0 %v438_v41 }
 0x198   : > { %v437_v44 = vmul.f32 0.1, %v431_v39  ;;  %vm435_vm2 = vcmp.gt.f32.partialorder %v431_v39, 0.0 }
 0x19a   : > { %v439_v46 = vsel %vm435_vm2, %v431_v39, %v437_v44 }
 0x19b   : > { %1143 = vmatmul.mubr.f32.vlgmr.msra.gmra.mrb[0].mxu1 %v439_v46  ;;  %1220 = vmatmul.mubr.f32.vlgmr.msra.gmra.mrb[4].mxu0 %v439_v46 }
 0x19c   : > { %1303 = vmatpush3.bf16.msra.mxu1 %v1300_v32  ;;  %1177 = vmatprep.mubr.f32.mxu1 %v438_v41 }
 0x19d   : > { %1305 = vmatprep.subr.bf16.mxu1 %v1304_v45 }
 0x1a0   : > { %1307 = vmatpush3.bf16.msra.mxu1 %v1304_v45 }
 0x1a1   : > { %1309 = vmatprep.subr.bf16.mxu1 %v1308_v49 }
 0x1a4   : > { %1311 = vmatpush3.bf16.msra.mxu1 %v1308_v49 }
 0x1a5   : > { %1313 = vmatprep.subr.bf16.mxu1 %v1312_v52 }
 0x1a8   : > { %1315 = vmatpush3.bf16.msra.mxu1 %v1312_v52 }
 0x1a9   : > { %1317 = vmatprep.subr.bf16.mxu1 %v1316_v55 }
 0x1ac   : > { %1319 = vmatpush3.bf16.msra.mxu1 %v1316_v55 }
 0x1ad   : > { %1321 = vmatprep.subr.bf16.mxu1 %v1320_v58 }
 0x1b0   : > { %1323 = vmatpush3.bf16.msra.mxu1 %v1320_v58 }
 0x1b1   : > { %1325 = vmatprep.subr.bf16.mxu1 %v1324_v61 }
 0x1b4   : > { %1327 = vmatpush3.bf16.msra.mxu1 %v1324_v61 }
 0x1b5   : > { %1329 = vmatprep.subr.bf16.mxu1 %v1328_v1 }
 0x1b8   : > { %1331 = vmatpush3.bf16.msra.mxu1 %v1328_v1 }
 0x1bb   : > { %1178 = vmatmul.mubr.f32.vlgmr.msra.gmra.mrb[2].mxu1 %v439_v46 }
 0x1bc   : > { %1184 = vmatprep.mubr.msk.f32.mxu1 %vm642_vm3, %v640_v2 }
 0x26e   : > { %v1144_v3 = vpop.f32.mrb[0].mxu1  ;;  %v1221_v4 = vpop.f32.mrb[4].mxu0 }
 0x26f   : > { %v522_v5 = vpop.f32.mrb[1].mxu1  ;;  %v790_v6 = vpop.f32.mrb[5].mxu0 }
 0x270   : > { %v1332_v7 = vpack.c.bf16 %v1144_v3, %v522_v5 }
 0x272   : > { %1333 = vmatprep.subr.bf16.mxu1 %v1332_v7 }
 0x273   : > { %1335 = vmatpush3.bf16.msra.mxu1 %v1332_v7 }
 0x276   : > { %1185 = vmatmul.mubr.msk.f32.vlgmr.msra.gmra.mrb[4].mxu1 %vm642_vm3, %v641_v0 }
 0x277   : > { %1226 = vmatprep.mubr.msk.f32.mxu1 %vm642_vm3, %v800_v8 }
 0x28e   : > { %v1179_v9 = vpop.f32.mrb[2].mxu1 }
 0x28f   : > { %v631_v10 = vpop.f32.mrb[3].mxu1 }
 0x290   : > { %v1368_v11 = vpack.c.bf16 %v1179_v9, %v631_v10 }
 0x292   : > { %1369 = vmatprep.subr.bf16.mxu1 %v1368_v11 }
 0x293   : > { %1371 = vmatpush3.bf16.msra.mxu1 %v1368_v11 }
 0x296   : > { %1227 = vmatmul.mubr.msk.f32.vlgmr.msra.gmra.mrb[6].mxu1 %vm642_vm3, %v801_v12 }
 0x349   : > { %v1186_v13 = vpop.f32.mrb[4].mxu1 }
 0x34a   : > { %v796_v14 = vadd.f32 %v1221_v4, %v1186_v13  ;;  %v715_v15 = vpop.f32.mrb[5].mxu1 }
 0x34b   : > { %v791_v16 = vadd.f32 %v790_v6, %v715_v15 }
 0x369   : > { %v1228_v17 = vpop.f32.mrb[6].mxu1 }
 0x36a   : > { %v884_v19 = vadd.f32 %v1228_v17, %v796_v14  ;;  %v874_v20 = vpop.f32.mrb[7].mxu1 }
 0x36b   : > { %v883_v21 = vadd.f32 %v874_v20, %v791_v16 }
 0x36c   : > { %v893_v22 = vadd.f32 %v1040_v18, %v884_v19 }
 0x36d   : > { %v892_v23 = vadd.f32 %v1040_v18, %v883_v21 }
 0x36e   : > { %vm895_vm4 = vcmp.gt.f32.partialorder %v893_v22, 0.0  ;;  %v897_v24 = vmul.f32 0.1, %v893_v22 }
 0x36f   : > { %vm894_vm5 = vcmp.gt.f32.partialorder %v892_v23, 0.0  ;;  %v896_v25 = vmul.f32 0.1, %v892_v23 }
 0x370   : > { %v899_v26 = vsel %vm895_vm4, %v893_v22, %v897_v24 }
 0x371   : > { %901 = vst [vmem:[%s313_s10 + $0x8] sm:$0xff] %v899_v26  ;;  %v898_v27 = vsel %vm894_vm5, %v892_v23, %v896_v25 }
 0x372   : > { %900 = vst [vmem:[%s313_s10] sm:$0xff] %v898_v27 }
 0x373   : > { %1588 = shalt.err (!%p1585_p4)
}
 0x374   : > { %s1589_s29 = scalar_lea.hbm %s1955_s13, 256  ;;  %s1593_s7 = scalar_lea.hbm %s2005_s6, 512 }
 0x375   : > { %p1590_p9 = scmp.ne.s32.totalorder %s1955_s13, %s1589_s29  ;;  %p1594_p8 = scmp.lt.u32.totalorder %s1955_s13, %s2005_s6 }
 0x376   : > { %p1595_p13 = scmp.lt.u32.totalorder %s1593_s7, %s1589_s29  ;;  %p1597_p10 = scmp.lt.u32.totalorder %s1589_s29, %s1955_s13 }
 0x377   : > { %p1591_p0 = pnand %p1590_p9, %p1853_p5 }
 0x378   : > { %p1596_p6 = por %p1595_p13, %p1594_p8 }
 0x379   : > { %p1592_p11 = pneg %p1591_p0 }
 0x37a   : > { %p1598_p3 = por %p1597_p10, %p1596_p6 }
 0x37c   : > { %p1599_p7 = pnand %p1598_p3, %p1592_p11 }
 0x37e   : > { %1602 = shalt.err (!%p1599_p7)
}
 0x37f   : > { %s1662_s8 = smov 128   ;;  %s1663_s11 = smov 8  }
 0x380   : > { %1390 = dma.vmem_to_hbm [thread:$0]  (%p1853_p5), %s1950_s9, 256, %s1955_s13, %s903_s25, %s1662_s8, %s1662_s8, %s1663_s11  }
 0x381 PF: > { %s931_s12 = sand.u32 1, %s1637_s21   ;;  %p2023_p12 = scmp.ne.s32.totalorder %s2010_s28, 0 }
 0x382   : > { %p2024_p1 = scmp.ge.s32.totalorder %s1649_s24, 2  ;;  %s932_s30 = scalar_lea.sflag [#allocation4], %s931_s12 }
 0x384   : > { %p1407_p2 = pnand %p2024_p1, %p2023_p12 }
 0x386   : > { %1632 = dma.done.wait (!%p1407_p2), %s932_s30, 256  }
 0x387   : > { %1634 = vsyncadd (!%p1407_p2), %s932_s30, 4294967040  ;;  %p21_p4 = scmp.ge.s32.totalorder %s1839_s18, 4   ;;  %s2025_s21 = smov %s1641_s22 }
 0x388   : > { %s2026_s22 = smov %s1645_s23  ;;  %s2027_s23 = smov %s1849_s14 }
 0x389   : > { %s2028_s24 = smov %s1839_s18  ;;  %23 = sbr.rel (!%p21_p4) target bundleno = 7 (0x7), region = 104 }
 0x390   :  { %937 = vsyncpa [#allocation3], 1 }
 0x391   :  { %939 = vsyncpa [#allocation3 + $0x1], 1 }
 0x392   :  { %940 = vsyncpa [#allocation6], 1 }
 0x393   :  { %941 = vsyncpa [#allocation9], 1 }
 0x394   :  { %942 = vsyncpa [#allocation4], 1 }
 0x395   :  { %944 = vsyncpa [#allocation4 + $0x1], 1 }

</bundles_post_ra>
